<compile_context>
chip_gen: v5e
topology: v5e:2x2
jax: 0.10.0
libtpu: 0.0.40
codegen_flags: <defaults>
</compile_context>

<pallas_src>
import jax
import jax.numpy as jnp
from jax import lax
from jax.experimental import pallas as pl
from jax.experimental.pallas import tpu as pltpu

block_size = 32      # max T (tril buffer size in the PyTorch module)
n_embedd = 384
head_size = 64


def attention_head_kernel(x_ref, wqkv_ref, mask_ref, o_ref):
    # x_ref: (Bblk, T, C) bf16; wqkv_ref: (C, 3H) bf16 (scale pre-folded into
    # the Wq columns); mask_ref: (T, T) f32 additive bias; o_ref: (Bblk, T, H).
    Bblk, T, C = x_ref.shape
    H3 = wqkv_ref.shape[1]
    H = H3 // 3

    # Fused QKV projection on the flattened (Bblk*T, C) slab: one MXU matmul
    # with N = 3H = 192. Operands are already bf16; accumulate in f32.
    x2d = x_ref[...].reshape(Bblk * T, C)
    qkv = jnp.dot(x2d, wqkv_ref[...],
                  preferred_element_type=jnp.float32)             # (Bblk*T, 3H) f32
    # Single bf16 cast of the whole qkv tensor; q/k/v sliced from it.
    qkv = qkv.reshape(Bblk, T, H3).astype(jnp.bfloat16)

    q = qkv[:, :, 0 * H:1 * H]                                    # (Bblk, T, H) bf16
    k = qkv[:, :, 1 * H:2 * H]
    v = qkv[:, :, 2 * H:3 * H]

    # scores[b, t, s] = sum_d q[b,t,d] * k[b,s,d] — contract H directly,
    # batched over Bblk; no k transpose. 1/sqrt(H) already folded into Wq.
    scores = lax.dot_general(
        q, k,
        dimension_numbers=(((2,), (2,)), ((0,), (0,))),
        preferred_element_type=jnp.float32)                        # (Bblk, T, T) f32
    scores = scores + mask_ref[...][None, :, :]                    # causal mask (additive)

    # softmax along the last axis (f32); the diagonal is never masked, so the
    # row max is finite and no inf-inf NaN can occur.
    scores = scores - jnp.max(scores, axis=-1, keepdims=True)
    p = jnp.exp(scores)
    p = p * pl.reciprocal(jnp.sum(p, axis=-1, keepdims=True), approx=True)

    # dropout: identity (eval mode)

    out = lax.dot_general(
        p.astype(jnp.bfloat16), v,
        dimension_numbers=(((2,), (1,)), ((0,), (0,))),
        preferred_element_type=jnp.float32)                        # (Bblk, T, H)
    o_ref[...] = out.astype(o_ref.dtype)


def _num_tensorcores():
    """Best-effort TensorCore count per chip (v7x has 2; v5e/v6e have 1)."""
    try:
        kind = jax.devices()[0].device_kind.lower()
    except Exception:
        return 1
    return 2 if ("v7" in kind or "7x" in kind) else 1


def _pick_batch_block(B, T, target_rows=1024, min_grid_steps=1):
    """Pick Bblk so Bblk*T <= target_rows (fills MXU M rows, stays far under
    even v7x's 64 MiB VMEM at bf16) while keeping >= min_grid_steps grid steps
    (so both v7x TensorCores get work). Bblk need not divide B — the wrapper
    zero-pads the batch."""
    bblk = max(1, min(B, target_rows // T))
    if min_grid_steps > 1:
        bblk = max(1, min(bblk, pl.cdiv(B, min_grid_steps)))
    return bblk


def attention_head(x, wq, wk, wv):
    B, T, C = x.shape
    H = wk.shape[1]
    out_dtype = x.dtype

    # Fold the 1/sqrt(H) score scale into the Wq columns (grid-invariant
    # constant), fuse the three projections along the output (lane) axis and
    # cast the weight to bf16 once here.
    scale = jnp.float32(H) ** -0.5
    wqkv = jnp.concatenate([wq * scale, wk, wv], axis=1).astype(jnp.bfloat16)

    # Additive causal mask: 0 where attendable, -inf strictly above diagonal.
    mask = jnp.where(jnp.tril(jnp.ones((T, T), dtype=bool)),
                     0.0, -jnp.inf).astype(jnp.float32)

    # bf16 x: halves the bandwidth-dominant HBM read; MXU operands are bf16
    # anyway, so numerics match the previous in-kernel cast.
    x_bf16 = x.astype(jnp.bfloat16)

    Bblk = _pick_batch_block(B, T, target_rows=1024,
                             min_grid_steps=_num_tensorcores())
    n_steps = pl.cdiv(B, Bblk)
    B_pad = n_steps * Bblk
    if B_pad != B:
        # Zero-padded rows produce finite (uniform-softmax) garbage that is
        # sliced off below; no NaNs since the mask diagonal is unmasked.
        x_bf16 = jnp.pad(x_bf16, ((0, B_pad - B), (0, 0), (0, 0)))

    out = pl.pallas_call(
        attention_head_kernel,
        out_shape=jax.ShapeDtypeStruct((B_pad, T, H), out_dtype),
        grid=(n_steps,),
        in_specs=[
            pl.BlockSpec((Bblk, T, C), lambda b: (b, 0, 0)),
            pl.BlockSpec((C, 3 * H), lambda b: (0, 0)),
            pl.BlockSpec((T, T), lambda b: (0, 0)),
        ],
        out_specs=pl.BlockSpec((Bblk, T, H), lambda b: (b, 0, 0)),
        compiler_params=pltpu.CompilerParams(
            dimension_semantics=("parallel",)),
    )(x_bf16, wqkv, mask)

    return out[:B] if B_pad != B else out


def attention_head_ref(x, wq, wk, wv):
    """Pure-JAX f32 reference matching the PyTorch forward (eval mode)."""
    k = x @ wk
    q = x @ wq
    v = x @ wv
    scale = k.shape[-1] ** -0.5
    scores = jnp.einsum("btd,bsd->bts", q, k) * scale
    T = x.shape[1]
    tril = jnp.tril(jnp.ones((T, T), dtype=bool))
    scores = jnp.where(tril[None, :, :], scores, -jnp.inf)
    p = jax.nn.softmax(scores, axis=-1)
    return p @ v


if __name__ == "__main__":
    key = jax.random.PRNGKey(0)
    kx, kk, kq, kv = jax.random.split(key, 4)

    B, T, C, H = 2, block_size, n_embedd, head_size

    x = jax.random.normal(kx, (B, T, C), dtype=jnp.float32)

    # Deterministic PyTorch-Linear-style init: U(-1/sqrt(C), 1/sqrt(C)),
    # stored as (C, H) so that x @ W == nn.Linear(C, H, bias=False)(x).
    bound = 1.0 / (C ** 0.5)
    wk = jax.random.uniform(kk, (C, H), jnp.float32, -bound, bound)
    wq = jax.random.uniform(kq, (C, H), jnp.float32, -bound, bound)
    wv = jax.random.uniform(kv, (C, H), jnp.float32, -bound, bound)

    out = attention_head(x, wq, wk, wv)
    out = jax.block_until_ready(out)

    ref = attention_head_ref(x, wq, wk, wv)
    assert out.shape == (B, T, H)
    # bf16 inputs / MXU operands + approx reciprocal -> looser tolerance than
    # pure f32.
    max_err = jnp.max(jnp.abs(out - ref))
    assert jnp.allclose(out, ref, atol=2e-2, rtol=2e-2), (
        f"mismatch vs reference: max abs err {max_err}")

    print("KERNEL_OK")
</pallas_src>

<mosaic_0001>
module attributes {stable_mosaic.version = 11 : i64} {
  func.func @attention_head_kernel(%arg0: i32, %arg1: memref<2x32x384xbf16, #tpu.memory_space<vmem>>, %arg2: memref<384x192xbf16, #tpu.memory_space<vmem>>, %arg3: memref<32x32xf32, #tpu.memory_space<vmem>>, %arg4: memref<2x32x64xf32, #tpu.memory_space<vmem>>) attributes {dimension_semantics = [#tpu.dimension_semantics<parallel>], iteration_bounds = array<i64: 1>, scalar_prefetch = 0 : i64, scratch_operands = 0 : i64, tpu.core_type = #tpu.core_type<tc>, window_params = [{transform_indices = @transform_0, window_bounds = array<i64: 2, 32, 384>}, {pipeline_mode = #tpu.pipeline_mode<synchronous>, transform_indices = @transform_1, window_bounds = array<i64: 384, 192>}, {pipeline_mode = #tpu.pipeline_mode<synchronous>, transform_indices = @transform_2, window_bounds = array<i64: 32, 32>}, {transform_indices = @transform_3, window_bounds = array<i64: 2, 32, 64>}]} {
    %c0 = arith.constant 0 : index
    %c0_0 = arith.constant 0 : index
    %c0_1 = arith.constant 0 : index
    %0 = vector.load %arg1[%c0, %c0_0, %c0_1] : memref<2x32x384xbf16, #tpu.memory_space<vmem>>, vector<2x32x384xbf16>
    %1 = vector.shape_cast %0 : vector<2x32x384xbf16> to vector<64x384xbf16>
    %c0_2 = arith.constant 0 : index
    %c0_3 = arith.constant 0 : index
    %2 = vector.load %arg2[%c0_2, %c0_3] : memref<384x192xbf16, #tpu.memory_space<vmem>>, vector<384x192xbf16>
    %cst = arith.constant dense<0.000000e+00> : vector<64x192xf32>
    %3 = tpu.matmul %1, %2, %cst {dimension_numbers = #tpu.dot_dimension_numbers<[1], [0], [0], [1], [0, 0, 1, 1], [], []>} : vector<64x384xbf16>, vector<384x192xbf16>, vector<64x192xf32> -> vector<64x192xf32>
    %4 = vector.shape_cast %3 : vector<64x192xf32> to vector<2x32x192xf32>
    %5 = arith.truncf %4 : vector<2x32x192xf32> to vector<2x32x192xbf16>
    %6 = vector.extract_strided_slice %5 {offsets = [0, 0, 0], sizes = [2, 32, 64], strides = [1, 1, 1]} : vector<2x32x192xbf16> to vector<2x32x64xbf16>
    %7 = vector.extract_strided_slice %5 {offsets = [0, 0, 64], sizes = [2, 32, 64], strides = [1, 1, 1]} : vector<2x32x192xbf16> to vector<2x32x64xbf16>
    %8 = vector.extract_strided_slice %5 {offsets = [0, 0, 128], sizes = [2, 32, 64], strides = [1, 1, 1]} : vector<2x32x192xbf16> to vector<2x32x64xbf16>
    %cst_4 = arith.constant dense<0.000000e+00> : vector<2x32x32xf32>
    %9 = tpu.matmul %6, %7, %cst_4 {dimension_numbers = #tpu.dot_dimension_numbers<[2], [2], [1], [1], [0, 0, 0, 1, 1, 1], [0], [0]>} : vector<2x32x64xbf16>, vector<2x32x64xbf16>, vector<2x32x32xf32> -> vector<2x32x32xf32>
    %c0_5 = arith.constant 0 : index
    %c0_6 = arith.constant 0 : index
    %10 = vector.load %arg3[%c0_5, %c0_6] : memref<32x32xf32, #tpu.memory_space<vmem>>, vector<32x32xf32>
    %11 = vector.shape_cast %10 : vector<32x32xf32> to vector<1x32x32xf32>
    %12 = vector.broadcast %11 : vector<1x32x32xf32> to vector<2x32x32xf32>
    %13 = arith.addf %9, %12 : vector<2x32x32xf32>
    %cst_7 = arith.constant dense<0xFF800000> : vector<2x32xf32>
    %14 = vector.multi_reduction <maximumf>, %13, %cst_7 [2] : vector<2x32x32xf32> to vector<2x32xf32>
    %15 = vector.shape_cast %14 : vector<2x32xf32> to vector<2x32x1xf32>
    %16 = vector.broadcast %15 : vector<2x32x1xf32> to vector<2x32x32xf32>
    %17 = arith.subf %13, %16 : vector<2x32x32xf32>
    %18 = math.exp %17 : vector<2x32x32xf32>
    %cst_8 = arith.constant dense<0.000000e+00> : vector<2x32xf32>
    %19 = vector.multi_reduction <add>, %18, %cst_8 [2] : vector<2x32x32xf32> to vector<2x32xf32>
    %20 = vector.shape_cast %19 : vector<2x32xf32> to vector<2x32x1xf32>
    %21 = tpu.reciprocal %20 {approx = true} : vector<2x32x1xf32> -> vector<2x32x1xf32>
    %22 = vector.broadcast %21 : vector<2x32x1xf32> to vector<2x32x32xf32>
    %23 = arith.mulf %18, %22 : vector<2x32x32xf32>
    %24 = arith.truncf %23 : vector<2x32x32xf32> to vector<2x32x32xbf16>
    %cst_9 = arith.constant dense<0.000000e+00> : vector<2x32x64xf32>
    %25 = tpu.matmul %24, %8, %cst_9 {dimension_numbers = #tpu.dot_dimension_numbers<[2], [1], [1], [2], [0, 0, 0, 1, 1, 2], [0], [0]>} : vector<2x32x32xbf16>, vector<2x32x64xbf16>, vector<2x32x64xf32> -> vector<2x32x64xf32>
    %c0_10 = arith.constant 0 : index
    %c0_11 = arith.constant 0 : index
    %c0_12 = arith.constant 0 : index
    %26 = vector.load %arg4[%c0_10, %c0_11, %c0_12] : memref<2x32x64xf32, #tpu.memory_space<vmem>>, vector<2x32x64xf32>
    tpu.vector_store %arg4[%c0_10, %c0_11, %c0_12], %25 {strides = array<i32>} : memref<2x32x64xf32, #tpu.memory_space<vmem>>, vector<2x32x64xf32>,
    return
  }
  func.func @transform_0(%arg0: i32) -> (i32, i32, i32) {
    %c0_i32 = arith.constant 0 : i32
    %c0_i32_0 = arith.constant 0 : i32
    %c0_i32_1 = arith.constant 0 : i32
    return %arg0, %c0_i32, %c0_i32_0 : i32, i32, i32
  }
  func.func @transform_1(%arg0: i32) -> (i32, i32) {
    %c0_i32 = arith.constant 0 : i32
    %c0_i32_0 = arith.constant 0 : i32
    %c0_i32_1 = arith.constant 0 : i32
    return %c0_i32, %c0_i32_0 : i32, i32
  }
  func.func @transform_2(%arg0: i32) -> (i32, i32) {
    %c0_i32 = arith.constant 0 : i32
    %c0_i32_0 = arith.constant 0 : i32
    %c0_i32_1 = arith.constant 0 : i32
    return %c0_i32, %c0_i32_0 : i32, i32
  }
  func.func @transform_3(%arg0: i32) -> (i32, i32, i32) {
    %c0_i32 = arith.constant 0 : i32
    %c0_i32_0 = arith.constant 0 : i32
    %c0_i32_1 = arith.constant 0 : i32
    return %arg0, %c0_i32, %c0_i32_0 : i32, i32, i32
  }
}

</mosaic_0001>

<bundles_post_ra>
// kernel: tpu_custom_call.1
= control target key start
LH: loop header
LB: loop body
LE: loop exit
PB: predicated region body
PF: predicated region fallthrough
CT: control target
= control target key end

     0   :  { %s1742_s0 = inlined_call_operand.vmem [shape: bf16[2,32,384], index: 0, kind: input, shape index: {}]   ;;  %s1743_s1 = inlined_call_operand.vmem [shape: bf16[384,192], index: 1, kind: input, shape index: {}]   ;;  %s1744_s2 = inlined_call_operand.vmem [shape: f32[32,32], index: 2, kind: input, shape index: {}]   ;;  %s1745_s3 = inlined_call_operand.hbm [shape: f32[2,32,64], index: 3, kind: output, shape index: {}]  }
   0x1   :  { %v984_v0 = vld [vmem:[%s1743_s1 + $0x70] sm:$0xf]  ;;  %v1153_v1 = vld [vmem:[%s1743_s1 + $0x74] sm:$0xf0]  ;;  %v976_v9 = vld [vmem:[%s1743_s1 + $0x60] sm:$0xf] }
   0x2   :  { %v1048_v2 = vld [vmem:[%s1743_s1 + $0xf0] sm:$0xf]  ;;  %v985_v3 = vor.u32 %v1153_v1, %v984_v0  ;;  %v1169_v4 = vld [vmem:[%s1743_s1 + $0xf4] sm:$0xf0]  ;;  %v1151_v10 = vld [vmem:[%s1743_s1 + $0x64] sm:$0xf0] }
   0x3   :  { %v1112_v5 = vld [vmem:[%s1743_s1 + $0x170] sm:$0xf]  ;;  %v1185_v6 = vld [vmem:[%s1743_s1 + $0x174] sm:$0xf0]  ;;  %v1049_v7 = vor.u32 %v1169_v4, %v1048_v2  ;;  %v1040_v11 = vld [vmem:[%s1743_s1 + $0xe0] sm:$0xf]  ;;  %v977_v12 = vor.u32 %v1151_v10, %v976_v9 }
   0x4   :  { %v1113_v8 = vor.u32 %v1185_v6, %v1112_v5  ;;  %384 = vmatpush.bf16.msra.mxu0 %v985_v3  ;;  %v1167_v13 = vld [vmem:[%s1743_s1 + $0xe4] sm:$0xf0]  ;;  %v1104_v14 = vld [vmem:[%s1743_s1 + $0x160] sm:$0xf]  ;;  %v968_v18 = vld [vmem:[%s1743_s1 + $0x50] sm:$0xf] }
   0x5   :  { %v1183_v15 = vld [vmem:[%s1743_s1 + $0x164] sm:$0xf0]  ;;  %413 = vmatpush.bf16.msra.mxu1 %v1049_v7  ;;  %v1041_v16 = vor.u32 %v1167_v13, %v1040_v11  ;;  %v1149_v19 = vld [vmem:[%s1743_s1 + $0x54] sm:$0xf0]  ;;  %v1032_v20 = vld [vmem:[%s1743_s1 + $0xd0] sm:$0xf] }
   0x6   :  { %442 = vmatpush.bf16.msra.mxu2 %v1113_v8  ;;  %v1105_v17 = vor.u32 %v1183_v15, %v1104_v14  ;;  %v1165_v21 = vld [vmem:[%s1743_s1 + $0xd4] sm:$0xf0]  ;;  %v1096_v22 = vld [vmem:[%s1743_s1 + $0x150] sm:$0xf]  ;;  %v969_v24 = vor.u32 %v1149_v19, %v968_v18  ;;  %v960_v27 = vld [vmem:[%s1743_s1 + $0x40] sm:$0xf] }
   0x7   :  { %v1181_v23 = vld [vmem:[%s1743_s1 + $0x154] sm:$0xf0]  ;;  %v1033_v25 = vor.u32 %v1165_v21, %v1032_v20  ;;  %v1147_v28 = vld [vmem:[%s1743_s1 + $0x44] sm:$0xf0]  ;;  %v1024_v29 = vld [vmem:[%s1743_s1 + $0xc0] sm:$0xf] }
   0x8   :  { %385 = vmatpush.bf16.msra.mxu0 %v977_v12  ;;  %v1097_v26 = vor.u32 %v1181_v23, %v1096_v22  ;;  %v1163_v30 = vld [vmem:[%s1743_s1 + $0xc4] sm:$0xf0]  ;;  %v1088_v31 = vld [vmem:[%s1743_s1 + $0x140] sm:$0xf]  ;;  %v961_v33 = vor.u32 %v1147_v28, %v960_v27  ;;  %v952_v36 = vld [vmem:[%s1743_s1 + $0x30] sm:$0xf] }
   0x9   :  { %414 = vmatpush.bf16.msra.mxu1 %v1041_v16  ;;  %v1179_v32 = vld [vmem:[%s1743_s1 + $0x144] sm:$0xf0]  ;;  %v1025_v34 = vor.u32 %v1163_v30, %v1024_v29  ;;  %v1145_v37 = vld [vmem:[%s1743_s1 + $0x34] sm:$0xf0]  ;;  %v1016_v38 = vld [vmem:[%s1743_s1 + $0xb0] sm:$0xf] }
   0xa   :  { %443 = vmatpush.bf16.msra.mxu2 %v1105_v17  ;;  %v1089_v35 = vor.u32 %v1179_v32, %v1088_v31  ;;  %v1161_v39 = vld [vmem:[%s1743_s1 + $0xb4] sm:$0xf0]  ;;  %v1080_v40 = vld [vmem:[%s1743_s1 + $0x130] sm:$0xf]  ;;  %v953_v42 = vor.u32 %v1145_v37, %v952_v36  ;;  %v944_v45 = vld [vmem:[%s1743_s1 + $0x20] sm:$0xf] }
   0xb   :  { %v1177_v41 = vld [vmem:[%s1743_s1 + $0x134] sm:$0xf0]  ;;  %v1017_v43 = vor.u32 %v1161_v39, %v1016_v38  ;;  %v1143_v46 = vld [vmem:[%s1743_s1 + $0x24] sm:$0xf0]  ;;  %v1008_v47 = vld [vmem:[%s1743_s1 + $0xa0] sm:$0xf] }
   0xc   :  { %386 = vmatpush.bf16.msra.mxu0 %v969_v24  ;;  %v1081_v44 = vor.u32 %v1177_v41, %v1080_v40  ;;  %v1159_v48 = vld [vmem:[%s1743_s1 + $0xa4] sm:$0xf0]  ;;  %v1072_v49 = vld [vmem:[%s1743_s1 + $0x120] sm:$0xf]  ;;  %v936_v51 = vld [vmem:[%s1743_s1 + $0x10] sm:$0xf]  ;;  %v945_v52 = vor.u32 %v1143_v46, %v944_v45 }
   0xd   :  { %415 = vmatpush.bf16.msra.mxu1 %v1033_v25  ;;  %v1175_v50 = vld [vmem:[%s1743_s1 + $0x124] sm:$0xf0]  ;;  %v1141_v53 = vld [vmem:[%s1743_s1 + $0x14] sm:$0xf0]  ;;  %v1000_v54 = vld [vmem:[%s1743_s1 + $0x90] sm:$0xf]  ;;  %v1009_v56 = vor.u32 %v1159_v48, %v1008_v47 }
   0xe   :  { %444 = vmatpush.bf16.msra.mxu2 %v1097_v26  ;;  %v1157_v55 = vld [vmem:[%s1743_s1 + $0x94] sm:$0xf0]  ;;  %v1073_v57 = vor.u32 %v1175_v50, %v1072_v49  ;;  %v1152_v58 = vld [vmem:[%s1743_s1 + $0x74] sm:$0xf]  ;;  %v986_v59 = vld [vmem:[%s1743_s1 + $0x78] sm:$0xf0]  ;;  %v937_v1 = vor.u32 %v1141_v53, %v936_v51 }
   0xf   :  { %v1150_v60 = vld [vmem:[%s1743_s1 + $0x64] sm:$0xf]  ;;  %v1064_v61 = vld [vmem:[%s1743_s1 + $0x110] sm:$0xf]  ;;  %v1173_v62 = vld [vmem:[%s1743_s1 + $0x114] sm:$0xf0]  ;;  %v989_v63 = vor.u32 %v1152_v58, %v986_v59 }
  0x10   :  { %387 = vmatpush.bf16.msra.mxu0 %v961_v33  ;;  %v978_v0 = vld [vmem:[%s1743_s1 + $0x68] sm:$0xf0]  ;;  %v928_v2 = vld [vmem:[%s1743_s1] sm:$0xf]  ;;  %v1139_v3 = vld [vmem:[%s1743_s1 + $0x4] sm:$0xf0] }
  0x11   :  { %416 = vmatpush.bf16.msra.mxu1 %v1025_v34  ;;  %471 = vmatpush.bf16.msra.mxu3 %v989_v63  ;;  %v981_v4 = vor.u32 %v1150_v60, %v978_v0 }
  0x12   :  { %445 = vmatpush.bf16.msra.mxu2 %v1089_v35 }
  0x14   :  { %388 = vmatpush.bf16.msra.mxu0 %v953_v42 }
  0x15   :  { %417 = vmatpush.bf16.msra.mxu1 %v1017_v43 }
  0x16   :  { %446 = vmatpush.bf16.msra.mxu2 %v1081_v44 }
  0x18   :  { %389 = vmatpush.bf16.msra.mxu0 %v945_v52 }
  0x19   :  { %8 = vsyncpa [#allocation3], 0  ;;  %418 = vmatpush.bf16.msra.mxu1 %v1009_v56  ;;  %v1001_v5 = vor.u32 %v1157_v55, %v1000_v54  ;;  %v1065_v6 = vor.u32 %v1173_v62, %v1064_v61  ;;  %v992_v7 = vld [vmem:[%s1743_s1 + $0x80] sm:$0xf]  ;;  %v1148_v8 = vld [vmem:[%s1743_s1 + $0x54] sm:$0xf]  ;;  %v929_v13 = vor.u32 %v1139_v3, %v928_v2  ;;  %472 = vmatpush.bf16.msra.mxu3 %v981_v4 }
  0x1a   :  { %447 = vmatpush.bf16.msra.mxu2 %v1073_v57  ;;  %v970_v9 = vld [vmem:[%s1743_s1 + $0x58] sm:$0xf0]  ;;  %v1155_v10 = vld [vmem:[%s1743_s1 + $0x84] sm:$0xf0]  ;;  %v1056_v11 = vld [vmem:[%s1743_s1 + $0x100] sm:$0xf] }
  0x1b   :  { %v1171_v12 = vld [vmem:[%s1743_s1 + $0x104] sm:$0xf0]  ;;  %v880_v14 = vld [vmem:[%s1742_s0] sm:$0xf]  ;;  %v1127_v15 = vld [vmem:[%s1742_s0 + $0x8] sm:$0xf0]  ;;  %v973_v17 = vor.u32 %v1148_v8, %v970_v9  ;;  %v993_v18 = vor.u32 %v1155_v10, %v992_v7 }
  0x1c   :  { %390 = vmatpush.bf16.msra.mxu0 %v937_v1  ;;  %v1126_v16 = vld [vmem:[%s1742_s0 + $0x4] sm:$0xf]  ;;  %v1057_v19 = vor.u32 %v1171_v12, %v1056_v11  ;;  %v882_v20 = vld [vmem:[%s1742_s0 + $0xc] sm:$0xf0]  ;;  %v888_v21 = vld [vmem:[%s1742_s0 + $0x8] sm:$0xf]  ;;  %v1458_v25 = vor.u32 %v1127_v15, %v880_v14 }
  0x1d   :  { %419 = vmatpush.bf16.msra.mxu1 %v1001_v5  ;;  %v1128_v22 = vld [vmem:[%s1742_s0 + $0x10] sm:$0xf0]  ;;  %v1146_v23 = vld [vmem:[%s1743_s1 + $0x44] sm:$0xf]  ;;  %v962_v24 = vld [vmem:[%s1743_s1 + $0x48] sm:$0xf0]  ;;  %v1460_v26 = vor.u32 %v1126_v16, %v882_v20  ;;  %473 = vmatpush.bf16.msra.mxu3 %v973_v17 }
  0x1e   :  { %448 = vmatpush.bf16.msra.mxu2 %v1065_v6  ;;  %v1462_v27 = vor.u32 %v1128_v22, %v888_v21  ;;  %v965_v28 = vor.u32 %v1146_v23, %v962_v24  ;;  %v1168_v29 = vld [vmem:[%s1743_s1 + $0xf4] sm:$0xf]  ;;  %v1050_v30 = vld [vmem:[%s1743_s1 + $0xf8] sm:$0xf0]  ;;  %v1166_v37 = vld [vmem:[%s1743_s1 + $0xe4] sm:$0xf] }
  0x1f   :  { %v1053_v31 = vor.u32 %v1168_v29, %v1050_v30  ;;  %v1184_v32 = vld [vmem:[%s1743_s1 + $0x174] sm:$0xf]  ;;  %v1114_v33 = vld [vmem:[%s1743_s1 + $0x178] sm:$0xf0]  ;;  %v1042_v39 = vld [vmem:[%s1743_s1 + $0xe8] sm:$0xf0] }
  0x20   :  { %391 = vmatpush.bf16.msra.mxu0 %v929_v13  ;;  %v1117_v34 = vor.u32 %v1184_v32, %v1114_v33  ;;  %v1144_v35 = vld [vmem:[%s1743_s1 + $0x34] sm:$0xf]  ;;  %v954_v36 = vld [vmem:[%s1743_s1 + $0x38] sm:$0xf0]  ;;  %v1182_v40 = vld [vmem:[%s1743_s1 + $0x164] sm:$0xf]  ;;  %v1045_v42 = vor.u32 %v1166_v37, %v1042_v39 }
  0x21   :  { %420 = vmatpush.bf16.msra.mxu1 %v993_v18  ;;  %474 = vmatpush.bf16.msra.mxu3 %v965_v28  ;;  %v957_v38 = vor.u32 %v1144_v35, %v954_v36  ;;  %v1106_v41 = vld [vmem:[%s1743_s1 + $0x168] sm:$0xf0]  ;;  %v1142_v44 = vld [vmem:[%s1743_s1 + $0x24] sm:$0xf]  ;;  %v1164_v46 = vld [vmem:[%s1743_s1 + $0xd4] sm:$0xf] }
  0x22   :  { %449 = vmatpush.bf16.msra.mxu2 %v1057_v19  ;;  %v1109_v43 = vor.u32 %v1182_v40, %v1106_v41  ;;  %v946_v45 = vld [vmem:[%s1743_s1 + $0x28] sm:$0xf0]  ;;  %v1034_v47 = vld [vmem:[%s1743_s1 + $0xd8] sm:$0xf0]  ;;  %v1180_v48 = vld [vmem:[%s1743_s1 + $0x154] sm:$0xf] }
  0x23   :  { %392 = vmatmul.bf16.vlgmr.msra.gmra.mxu0 %v1458_v25  ;;  %v1098_v49 = vld [vmem:[%s1743_s1 + $0x158] sm:$0xf0]  ;;  %v949_v50 = vor.u32 %v1142_v44, %v946_v45  ;;  %v1037_v51 = vor.u32 %v1164_v46, %v1034_v47  ;;  %v1140_v52 = vld [vmem:[%s1743_s1 + $0x14] sm:$0xf]  ;;  %v1162_v55 = vld [vmem:[%s1743_s1 + $0xc4] sm:$0xf] }
  0x24   :  { %421 = vmatmul.bf16.vlgmr.msra.gmra.mxu1 %v1460_v26  ;;  %500 = vmatpush.bf16.msrb.mxu0 %v1053_v31  ;;  %v1101_v53 = vor.u32 %v1180_v48, %v1098_v49  ;;  %v938_v54 = vld [vmem:[%s1743_s1 + $0x18] sm:$0xf0]  ;;  %v1026_v56 = vld [vmem:[%s1743_s1 + $0xc8] sm:$0xf0]  ;;  %v1178_v57 = vld [vmem:[%s1743_s1 + $0x144] sm:$0xf] }
  0x25   :  { %450 = vmatmul.bf16.vlgmr.msra.gmra.mxu2 %v1462_v27  ;;  %529 = vmatpush.bf16.msrb.mxu1 %v1117_v34  ;;  %v1090_v58 = vld [vmem:[%s1743_s1 + $0x148] sm:$0xf0]  ;;  %v892_v59 = vld [vmem:[%s1742_s0 + $0x18] sm:$0xf]  ;;  %v1130_v60 = vld [vmem:[%s1742_s0 + $0x20] sm:$0xf0]  ;;  %v941_v1 = vor.u32 %v1140_v52, %v938_v54  ;;  %v1029_v2 = vor.u32 %v1162_v55, %v1026_v56 }
  0x26   :  { %475 = vmatpush.bf16.msra.mxu3 %v957_v38  ;;  %v1129_v61 = vld [vmem:[%s1742_s0 + $0x1c] sm:$0xf]  ;;  %v894_v62 = vld [vmem:[%s1742_s0 + $0x24] sm:$0xf0]  ;;  %v900_v63 = vld [vmem:[%s1742_s0 + $0x20] sm:$0xf]  ;;  %v1093_v3 = vor.u32 %v1178_v57, %v1090_v58  ;;  %v893_v6 = vor.u32 %v1130_v60, %v892_v59 }
  0x27   :  { %v1131_v0 = vld [vmem:[%s1742_s0 + $0x28] sm:$0xf0]  ;;  %v1138_v4 = vld [vmem:[%s1743_s1 + $0x4] sm:$0xf]  ;;  %v1557_v7 = vor.u32 %v1129_v61, %v894_v62  ;;  %v1160_v10 = vld [vmem:[%s1743_s1 + $0xb4] sm:$0xf] }
  0x28   :  { %501 = vmatpush.bf16.msrb.mxu0 %v1045_v42  ;;  %v930_v5 = vld [vmem:[%s1743_s1 + $0x8] sm:$0xf0]  ;;  %v1559_v8 = vor.u32 %v1131_v0, %v900_v63  ;;  %v1018_v11 = vld [vmem:[%s1743_s1 + $0xb8] sm:$0xf0]  ;;  %v1176_v13 = vld [vmem:[%s1743_s1 + $0x134] sm:$0xf] }
  0x29   :  { %530 = vmatpush.bf16.msrb.mxu1 %v1109_v43  ;;  %v933_v9 = vor.u32 %v1138_v4, %v930_v5  ;;  %v1021_v12 = vor.u32 %v1160_v10, %v1018_v11  ;;  %v1082_v14 = vld [vmem:[%s1743_s1 + $0x138] sm:$0xf0]  ;;  %v1158_v16 = vld [vmem:[%s1743_s1 + $0xa4] sm:$0xf]  ;;  %v1010_v17 = vld [vmem:[%s1743_s1 + $0xa8] sm:$0xf0] }
  0x2a   :  { %476 = vmatpush.bf16.msra.mxu3 %v949_v50  ;;  %v1085_v15 = vor.u32 %v1176_v13, %v1082_v14  ;;  %v1174_v18 = vld [vmem:[%s1743_s1 + $0x124] sm:$0xf]  ;;  %v1013_v19 = vor.u32 %v1158_v16, %v1010_v17  ;;  %v1074_v20 = vld [vmem:[%s1743_s1 + $0x128] sm:$0xf0]  ;;  %v1156_v22 = vld [vmem:[%s1743_s1 + $0x94] sm:$0xf] }
  0x2b   :  { %v1077_v21 = vor.u32 %v1174_v18, %v1074_v20  ;;  %v1002_v23 = vld [vmem:[%s1743_s1 + $0x98] sm:$0xf0]  ;;  %v1172_v24 = vld [vmem:[%s1743_s1 + $0x114] sm:$0xf]  ;;  %v1154_v31 = vld [vmem:[%s1743_s1 + $0x84] sm:$0xf] }
  0x2c   :  { %502 = vmatpush.bf16.msrb.mxu0 %v1037_v51  ;;  %v1066_v28 = vld [vmem:[%s1743_s1 + $0x118] sm:$0xf0]  ;;  %v1005_v29 = vor.u32 %v1156_v22, %v1002_v23  ;;  %v994_v32 = vld [vmem:[%s1743_s1 + $0x88] sm:$0xf0]  ;;  %v1170_v33 = vld [vmem:[%s1743_s1 + $0x104] sm:$0xf] }
  0x2d   :  { %531 = vmatpush.bf16.msrb.mxu1 %v1101_v53  ;;  %v1069_v30 = vor.u32 %v1172_v24, %v1066_v28  ;;  %v904_v34 = vld [vmem:[%s1742_s0 + $0x30] sm:$0xf]  ;;  %v1133_v35 = vld [vmem:[%s1742_s0 + $0x38] sm:$0xf0]  ;;  %v1132_v36 = vld [vmem:[%s1742_s0 + $0x34] sm:$0xf]  ;;  %v997_v40 = vor.u32 %v1154_v31, %v994_v32 }
  0x2e   :  { %477 = vmatpush.bf16.msra.mxu3 %v941_v1  ;;  %v906_v37 = vld [vmem:[%s1742_s0 + $0x3c] sm:$0xf0]  ;;  %v912_v38 = vld [vmem:[%s1742_s0 + $0x38] sm:$0xf]  ;;  %v1134_v39 = vld [vmem:[%s1742_s0 + $0x40] sm:$0xf0]  ;;  %v905_v42 = vor.u32 %v1133_v35, %v904_v34 }
  0x2f   :  { %v909_v43 = vor.u32 %v1132_v36, %v906_v37  ;;  %v913_v44 = vor.u32 %v1134_v39, %v912_v38  ;;  %v916_v45 = vld [vmem:[%s1742_s0 + $0x48] sm:$0xf]  ;;  %v1136_v46 = vld [vmem:[%s1742_s0 + $0x50] sm:$0xf0]  ;;  %v1135_v47 = vld [vmem:[%s1742_s0 + $0x4c] sm:$0xf] }
  0x30   :  { %503 = vmatpush.bf16.msrb.mxu0 %v1029_v2  ;;  %v918_v48 = vld [vmem:[%s1742_s0 + $0x54] sm:$0xf0]  ;;  %v924_v49 = vld [vmem:[%s1742_s0 + $0x50] sm:$0xf]  ;;  %v1137_v50 = vld [vmem:[%s1742_s0 + $0x58] sm:$0xf0]  ;;  %v917_v51 = vor.u32 %v1136_v46, %v916_v45 }
  0x31   :  { %532 = vmatpush.bf16.msrb.mxu1 %v1093_v3  ;;  %v921_v52 = vor.u32 %v1135_v47, %v918_v48  ;;  %v925_v53 = vor.u32 %v1137_v50, %v924_v49  ;;  %s1248_s0 = smov 64   ;;  %vm584_vm0 = vcmask 523264   ;;  %vm661_vm1 = vcmask 261120   ;;  %s866_s19 = sshll.u32 %s1745_s3, 4  ;;  %s867_s19 = int_to_ptr.hbm [resolvable:$true] %s866_s19 }
  0x32   :  { %478 = vmatpush.bf16.msra.mxu3 %v933_v9  ;;  %s1250_s20 = smov 128   ;;  %s1251_s21 = smov 8  }
  0x33   :  { %397 = vmatmul.bf16.gmra.mxu0 %v893_v6 }
  0x34   :  { %426 = vmatmul.bf16.gmra.mxu1 %v1557_v7  ;;  %504 = vmatpush.bf16.msrb.mxu0 %v1021_v12 }
  0x35   :  { %455 = vmatmul.bf16.gmra.mxu2 %v1559_v8  ;;  %533 = vmatpush.bf16.msrb.mxu1 %v1085_v15 }
  0x36   :  { %479 = vmatmul.bf16.vlgmr.msra.gmra.mxu3 %v1458_v25  ;;  %v1058_v25 = vld [vmem:[%s1743_s1 + $0x108] sm:$0xf0] }
  0x37   :  { %v1061_v41 = vor.u32 %v1170_v33, %v1058_v25 }
  0x38   :  { %505 = vmatpush.bf16.msrb.mxu0 %v1013_v19 }
  0x39   :  { %534 = vmatpush.bf16.msrb.mxu1 %v1077_v21 }
  0x3c   :  { %506 = vmatpush.bf16.msrb.mxu0 %v1005_v29 }
  0x3d   :  { %535 = vmatpush.bf16.msrb.mxu1 %v1069_v30 }
  0x40   :  { %507 = vmatpush.bf16.msrb.mxu0 %v997_v40 }
  0x41   :  { %536 = vmatpush.bf16.msrb.mxu1 %v1061_v41 }
  0x43   :  { %402 = vmatmul.bf16.gmra.mxu0 %v905_v42 }
  0x44   :  { %431 = vmatmul.bf16.gmra.mxu1 %v909_v43 }
  0x45   :  { %460 = vmatmul.bf16.gmra.mxu2 %v913_v44 }
  0x46   :  { %484 = vmatmul.bf16.gmra.mxu3 %v893_v6 }
  0x53   :  { %407 = vmatmul.bf16.gmra.mxu0 %v917_v51 }
  0x54   :  { %436 = vmatmul.bf16.gmra.mxu1 %v921_v52 }
  0x55   :  { %465 = vmatmul.bf16.gmra.mxu2 %v925_v53 }
  0x56   :  { %489 = vmatmul.bf16.gmra.mxu3 %v905_v42 }
  0x63   :  { %508 = vmatmul.bf16.vlgmr.msrb.gmra.mxu0 %v1460_v26 }
  0x64   :  { %537 = vmatmul.bf16.vlgmr.msrb.gmra.mxu1 %v1462_v27 }
  0x66   :  { %494 = vmatmul.bf16.gmra.mxu3 %v917_v51 }
  0x73   :  { %513 = vmatmul.bf16.gmra.mxu0 %v1557_v7 }
  0x74   :  { %542 = vmatmul.bf16.gmra.mxu1 %v1559_v8 }
  0x83   :  { %518 = vmatmul.bf16.gmra.mxu0 %v909_v43 }
  0x84   :  { %547 = vmatmul.bf16.gmra.mxu1 %v913_v44 }
  0x93   :  { %523 = vmatmul.bf16.gmra.mxu0 %v921_v52 }
  0x94   :  { %552 = vmatmul.bf16.gmra.mxu1 %v925_v53 }
  0xa0   :  { %v393_v54 = vpop.f32.mrf.mxu0 }
  0xa1   :  { %v422_v55 = vpop.f32.mrf.mxu1 }
  0xa2   :  { %v423_v56 = vadd.f32 %v422_v55, %v393_v54 }
  0xa8   :  { %v395_v57 = vpop.f32.mrf.mxu0  ;;  %v451_v4 = vpop.f32.mrf.mxu2 }
  0xa9   :  { %v424_v58 = vpop.f32.mrf.mxu1  ;;  %v452_v18 = vadd.f32 %v451_v4, %v423_v56 }
  0xaa   :  { %v425_v20 = vadd.f32 %v424_v58, %v395_v57 }
  0xb0   :  { %v398_v59 = vpop.f32.mrf.mxu0  ;;  %v453_v10 = vpop.f32.mrf.mxu2 }
  0xb1   :  { %v427_v60 = vpop.f32.mrf.mxu1  ;;  %v454_v24 = vadd.f32 %v453_v10, %v425_v20 }
  0xb2   :  { %v428_v61 = vadd.f32 %v427_v60, %v398_v59 }
  0xb8   :  { %v400_v26 = vpop.f32.mrf.mxu0  ;;  %v456_v15 = vpop.f32.mrf.mxu2 }
  0xb9   :  { %v429_v62 = vpop.f32.mrf.mxu1  ;;  %v480_v7 = vpop.f32.mrf.mxu3  ;;  %v457_v43 = vadd.f32 %v456_v15, %v428_v61 }
  0xba   :  { %v430_v45 = vadd.f32 %v429_v62, %v400_v26 }
  0xc0   :  { %v403_v27 = vpop.f32.mrf.mxu0  ;;  %v458_v31 = vpop.f32.mrf.mxu2 }
  0xc1   :  { %v432_v63 = vpop.f32.mrf.mxu1  ;;  %v482_v11 = vpop.f32.mrf.mxu3  ;;  %v459_v51 = vadd.f32 %v458_v31, %v430_v45 }
  0xc2   :  { %v1652_v0 = vadd.f32 %v432_v63, %v403_v27 }
  0xc8   :  { %v1654_v1 = vpop.f32.mrf.mxu0  ;;  %v461_v46 = vpop.f32.mrf.mxu2 }
  0xc9   :  { %v1656_v2 = vpop.f32.mrf.mxu1  ;;  %v485_v17 = vpop.f32.mrf.mxu3 }
  0xca   :  { %v435_v10 = vadd.f32 %v1656_v2, %v1654_v1 }
  0xd0   :  { %v408_v3 = vpop.f32.mrf.mxu0 }
  0xd1   :  { %v437_v5 = vpop.f32.mrf.mxu1  ;;  %v487_v34 = vpop.f32.mrf.mxu3 }
  0xd2   :  { %v1658_v6 = vadd.f32 %v437_v5, %v408_v3  ;;  %v463_v3 = vpop.f32.mrf.mxu2  ;;  %v462_v5 = vadd.f32 %v461_v46, %v1652_v0 }
  0xd8   :  { %v1660_v8 = vpop.f32.mrf.mxu0 }
  0xd9   :  { %v1662_v9 = vpop.f32.mrf.mxu1  ;;  %v490_v50 = vpop.f32.mrf.mxu3 }
  0xe0   :  { %v509_v12 = vpop.f32.mrf.mxu0 }
  0xe1   :  { %v510_v13 = vadd.f32 %v509_v12, %v480_v7  ;;  %v538_v14 = vpop.f32.mrf.mxu1  ;;  %v492_v62 = vpop.f32.mrf.mxu3 }
  0xe3   :  { %v539_v16 = vadd.f32 %v538_v14, %v510_v13  ;;  %v464_v14 = vadd.f32 %v463_v3, %v435_v10 }
  0xe5   :  { %v558_v21 = vpack.c.bf16 %v539_v16, %v452_v18  ;;  %v466_v16 = vpop.f32.mrf.mxu2 }
  0xe6   :  { %v467_v31 = vadd.f32 %v466_v16, %v1658_v6 }
  0xe7   :  { %v758_v29 = vrot.slane %v558_v21, 4  ;;  %v574_v33 = vunpack.c.l.b16 %v558_v21 }
  0xe8   :  { %v511_v19 = vpop.f32.mrf.mxu0 }
  0xe9   :  { %v512_v22 = vadd.f32 %v511_v19, %v482_v11  ;;  %v540_v23 = vpop.f32.mrf.mxu1  ;;  %v1664_v36 = vunpack.c.l.b16 %v758_v29  ;;  %v495_v19 = vpop.f32.mrf.mxu3 }
  0xeb   :  { %v541_v28 = vadd.f32 %v540_v23, %v512_v22 }
  0xed   :  { %v559_v30 = vpack.c.bf16 %v541_v28, %v454_v24 }
  0xef   :  { %v759_v32 = vrot.slane %v559_v30, 4  ;;  %v575_v25 = vunpack.c.l.b16 %v559_v30 }
  0xf0   :  { %v514_v35 = vpop.f32.mrf.mxu0 }
  0xf1   :  { %v1666_v37 = vunpack.c.l.b16 %v759_v32  ;;  %v515_v38 = vadd.f32 %v514_v35, %v485_v17  ;;  %v543_v39 = vpop.f32.mrf.mxu1  ;;  %v1668_v40 = vpack.c.b16 %v575_v25, %v574_v33  ;;  %v468_v32 = vpop.f32.mrf.mxu2 }
  0xf2   :  { %v497_v33 = vpop.f32.mrf.mxu3 }
  0xf3   :  { %580 = vrot.lane.b32.xlu1 %v1668_v40, %s1248_s0  ;;  %v776_v41 = vpack.c.b16 %v1666_v37, %v1664_v36  ;;  %v544_v42 = vadd.f32 %v543_v39, %v515_v38  ;;  %v566_v36 = vld [vmem:[%s1744_s2] sm:$0xff] }
  0xf5   :  { %v560_v47 = vpack.c.bf16 %v544_v42, %v457_v43 }
  0xf7   :  { %v760_v53 = vrot.slane %v560_v47, 4  ;;  %v576_v56 = vunpack.c.l.b16 %v560_v47 }
  0xf8   :  { %v516_v44 = vpop.f32.mrf.mxu0 }
  0xf9   :  { %v517_v48 = vadd.f32 %v516_v44, %v487_v34  ;;  %v545_v49 = vpop.f32.mrf.mxu1  ;;  %v774_v59 = vunpack.c.l.b16 %v760_v53  ;;  %v440_v34 = vadd.f32 %v1662_v9, %v1660_v8 }
  0xfb   :  { %v546_v52 = vadd.f32 %v545_v49, %v517_v48  ;;  %v469_v42 = vadd.f32 %v468_v32, %v440_v34 }
  0xfd   :  { %v561_v54 = vpack.c.bf16 %v546_v52, %v459_v51 }
  0xff   :  { %v761_v55 = vrot.slane %v561_v54, 4  ;;  %v577_v57 = vunpack.c.l.b16 %v561_v54 }
 0x100   :  { %v519_v58 = vpop.f32.mrf.mxu0 }
 0x101   :  { %v775_v60 = vunpack.c.l.b16 %v761_v55  ;;  %v520_v27 = vadd.f32 %v519_v58, %v490_v50  ;;  %v548_v63 = vpop.f32.mrf.mxu1  ;;  %v579_v61 = vpack.c.b16 %v577_v57, %v576_v56  ;;  %v567_v58 = vld [vmem:[%s1744_s2 + $0x8] sm:$0xff] }
 0x103   :  { %v777_v26 = vpack.c.b16 %v775_v60, %v774_v59  ;;  %582 = vrot.lane.b32.xlu0 %v579_v61, %s1248_s0  ;;  %v549_v4 = vadd.f32 %v548_v63, %v520_v27  ;;  %v568_v63 = vld [vmem:[%s1744_s2 + $0x10] sm:$0xff] }
 0x105   :  { %v562_v11 = vpack.c.bf16 %v549_v4, %v462_v5 }
 0x107   :  { %v805_v17 = vrot.slane %v562_v11, 4  ;;  %v620_v20 = vunpack.c.l.b16 %v562_v11 }
 0x108   :  { %v521_v7 = vpop.f32.mrf.mxu0 }
 0x109   :  { %v522_v12 = vadd.f32 %v521_v7, %v492_v62  ;;  %v550_v13 = vpop.f32.mrf.mxu1  ;;  %v819_v24 = vunpack.c.l.b16 %v805_v17  ;;  %v569_v62 = vld [vmem:[%s1744_s2 + $0x18] sm:$0xff]  ;;  %s1249_s2 = smov [#allocation2]  }
 0x10a   :  { %s864_s16 = sshll.u32 %s1249_s2, 4  ;;  %s865_s16 = int_to_ptr.vmem [resolvable:$true] %s864_s16 }
 0x10b   :  { %v551_v15 = vadd.f32 %v550_v13, %v522_v12 }
 0x10d   :  { %v563_v18 = vpack.c.bf16 %v551_v15, %v464_v14 }
 0x10f   :  { %v621_v21 = vunpack.c.l.b16 %v563_v18  ;;  %v806_v22 = vrot.slane %v563_v18, 4 }
 0x110   :  { %v524_v23 = vpop.f32.mrf.mxu0 }
 0x111   :  { %v820_v28 = vunpack.c.l.b16 %v806_v22  ;;  %v525_v0 = vadd.f32 %v524_v23, %v495_v19  ;;  %v553_v29 = vpop.f32.mrf.mxu1  ;;  %v624_v30 = vpack.c.b16 %v621_v21, %v620_v20 }
 0x113   :  { %626 = vrot.lane.b32.xlu1 %v624_v30, %s1248_s0  ;;  %v823_v1 = vpack.c.b16 %v820_v28, %v819_v24  ;;  %v554_v2 = vadd.f32 %v553_v29, %v525_v0 }
 0x115   :  { %v564_v35 = vpack.c.bf16 %v554_v2, %v467_v31 }
 0x117   :  { %v807_v44 = vrot.slane %v564_v35, 4  ;;  %v622_v46 = vunpack.c.l.b16 %v564_v35 }
 0x118   :  { %v526_v25 = vpop.f32.mrf.mxu0 }
 0x119   :  { %v527_v38 = vadd.f32 %v526_v25, %v497_v33  ;;  %v555_v39 = vpop.f32.mrf.mxu1  ;;  %v821_v49 = vunpack.c.l.b16 %v807_v44 }
 0x11b   :  { %v556_v43 = vadd.f32 %v555_v39, %v527_v38 }
 0x11d   :  { %v565_v45 = vpack.c.bf16 %v556_v43, %v469_v42 }
 0x11f   :  { %v623_v47 = vunpack.c.l.b16 %v565_v45  ;;  %v808_v48 = vrot.slane %v565_v45, 4 }
 0x121   :  { %v822_v50 = vunpack.c.l.b16 %v808_v48  ;;  %v625_v51 = vpack.c.b16 %v623_v47, %v622_v46 }
 0x123   :  { %v824_v6 = vpack.c.b16 %v822_v50, %v821_v49  ;;  %628 = vrot.lane.b32.xlu0 %v625_v51, %s1248_s0 }
 0x165   :  { %v581_v9 = vpop.permute.xlu1 %580 }
 0x166   :  { %v592_v53 = vsel %vm584_vm0, %v581_v9, 0 }
 0x175   :  { %v583_v52 = vpop.permute.xlu0 %582 }
 0x176   :  { %v595_v8 = vsel %vm584_vm0, %v583_v52, 0 }
 0x177   :  { %603 = vmatpush.bf16.xpose.msrb.mxu2 %v595_v8 }
 0x17f   :  { %604 = vmatpush.bf16.xpose.msrb.mxu2 %v592_v53 }
 0x185   :  { %v627_v56 = vpop.permute.xlu1 %626 }
 0x186   :  { %1118 = vmatmul.msk.bf16.vlgmr.msrb.gmra.mxu2 %vm584_vm0, %v1668_v40  ;;  %v637_v57 = vsel %vm584_vm0, %v627_v56, 0 }
 0x187   :  { %792 = vmatpush.bf16.msra.mxu2 %v777_v26 }
 0x18b   :  { %793 = vmatpush.bf16.msra.mxu2 %v776_v41 }
 0x195   :  { %v629_v54 = vpop.permute.xlu0 %628 }
 0x196   :  { %1119 = vmatmul.msk.bf16.gmra.mxu2 %vm584_vm0, %v579_v61  ;;  %v640_v55 = vsel %vm584_vm0, %v629_v54, 0 }
 0x197   :  { %648 = vmatpush.bf16.xpose.msrb.mxu3 %v640_v55 }
 0x19f   :  { %649 = vmatpush.bf16.xpose.msrb.mxu3 %v637_v57 }
 0x1a6   :  { %1120 = vmatmul.msk.bf16.vlgmr.msrb.gmra.mxu3 %vm584_vm0, %v624_v30 }
 0x1a7   :  { %839 = vmatpush.bf16.msra.mxu3 %v824_v6 }
 0x1ab   :  { %840 = vmatpush.bf16.msra.mxu3 %v823_v1 }
 0x1b6   :  { %1121 = vmatmul.msk.bf16.gmra.mxu3 %vm584_vm0, %v625_v51 }
 0x209   :  { %v606_v37 = vpop.f32.mrf.mxu2 }
 0x20a   :  { %v607_v40 = vadd.f32 %v606_v37, %v566_v36 }
 0x20c   :  { %v662_v41 = vsel %vm661_vm1, %v607_v40, -inf }
 0x20d   :  { %663 = vmax.xlane.f32.xlu2 %v662_v41 }
 0x211   :  { %v608_v59 = vpop.f32.mrf.mxu2 }
 0x212   :  { %v609_v60 = vadd.f32 %v608_v59, %v567_v58 }
 0x214   :  { %v665_v27 = vsel %vm661_vm1, %v609_v60, -inf }
 0x215   :  { %666 = vmax.xlane.f32.xlu2 %v665_v27 }
 0x219   :  { %v611_v61 = vpop.f32.mrf.mxu2 }
 0x21a   :  { %v612_v3 = vadd.f32 %v611_v61, %v568_v63 }
 0x21c   :  { %v668_v26 = vsel %vm661_vm1, %v612_v3, -inf }
 0x21d   :  { %669 = vmax.xlane.f32.xlu2 %v668_v26 }
 0x221   :  { %v613_v4 = vpop.f32.mrf.mxu2 }
 0x222   :  { %v614_v5 = vadd.f32 %v613_v4, %v569_v62 }
 0x224   :  { %v671_v7 = vsel %vm661_vm1, %v614_v5, -inf }
 0x225   :  { %672 = vmax.xlane.f32.xlu2 %v671_v7 }
 0x229   :  { %v651_v10 = vpop.f32.mrf.mxu3 }
 0x22a   :  { %v652_v11 = vadd.f32 %v651_v10, %v566_v36 }
 0x22c   :  { %v674_v12 = vsel %vm661_vm1, %v652_v11, -inf }
 0x22d   :  { %675 = vmax.xlane.f32.xlu0 %v674_v12 }
 0x231   :  { %v653_v13 = vpop.f32.mrf.mxu3 }
 0x232   :  { %v654_v14 = vadd.f32 %v653_v13, %v567_v58 }
 0x234   :  { %v677_v15 = vsel %vm661_vm1, %v654_v14, -inf }
 0x235   :  { %678 = vmax.xlane.f32.xlu1 %v677_v15 }
 0x239   :  { %v656_v16 = vpop.f32.mrf.mxu3 }
 0x23a   :  { %v657_v17 = vadd.f32 %v656_v16, %v568_v63 }
 0x23c   :  { %v680_v18 = vsel %vm661_vm1, %v657_v17, -inf }
 0x23d   :  { %681 = vmax.xlane.f32.xlu2 %v680_v18 }
 0x241   :  { %v658_v19 = vpop.f32.mrf.mxu3 }
 0x242   :  { %v659_v20 = vadd.f32 %v658_v19, %v569_v62 }
 0x244   :  { %v683_v21 = vsel %vm661_vm1, %v659_v20, -inf }
 0x245   :  { %684 = vmax.xlane.f32.xlu2 %v683_v21 }
 0x280   :  { %v664_v22 = vpop.xlane.xlu2 %663 }
 0x281   :  { %v686_v23 = vsub.f32 %v607_v40, %v664_v22 }
 0x283   :  { %v694_v24 = vmul.f32 1.442695, %v686_v23 }
 0x285   :  { %1190 = vpow2.f32 %v694_v24 }
 0x288   :  { %v667_v28 = vpop.xlane.xlu2 %666 }
 0x289   :  { %v687_v0 = vsub.f32 %v609_v60, %v667_v28 }
 0x28b   :  { %v1191_v29 = vpop.eup %1190  ;;  %v696_v30 = vmul.f32 1.442695, %v687_v0 }
 0x28c   :  { %v710_v1 = vsel %vm661_vm1, %v1191_v29, 0.0 }
 0x28d   :  { %1192 = vpow2.f32 %v696_v30  ;;  %711 = vadd.xlane.f32.xlu2 %v710_v1 }
 0x290   :  { %v670_v2 = vpop.xlane.xlu2 %669 }
 0x291   :  { %v688_v31 = vsub.f32 %v612_v3, %v670_v2 }
 0x293   :  { %v1193_v32 = vpop.eup %1192  ;;  %v698_v33 = vmul.f32 1.442695, %v688_v31 }
 0x294   :  { %v713_v25 = vsel %vm661_vm1, %v1193_v32, 0.0 }
 0x295   :  { %1194 = vpow2.f32 %v698_v33  ;;  %714 = vadd.xlane.f32.xlu2 %v713_v25 }
 0x298   :  { %v673_v38 = vpop.xlane.xlu2 %672 }
 0x299   :  { %v689_v43 = vsub.f32 %v614_v5, %v673_v38 }
 0x29b   :  { %v1717_v34 = vpop.eup %1194  ;;  %v700_v45 = vmul.f32 1.442695, %v689_v43 }
 0x29c   :  { %v716_v35 = vsel %vm661_vm1, %v1717_v34, 0.0 }
 0x29d   :  { %717 = vadd.xlane.f32.xlu2 %v716_v35 }
 0x2a0   :  { %v676_v39 = vpop.xlane.xlu0 %675 }
 0x2a1   :  { %v690_v42 = vsub.f32 %v652_v11, %v676_v39 }
 0x2a3   :  { %v702_v44 = vmul.f32 1.442695, %v690_v42 }
 0x2a5   :  { %1196 = vpow2.f32 %v702_v44 }
 0x2a6   :  { %1198 = vpow2.f32 %v700_v45 }
 0x2a8   :  { %v679_v46 = vpop.xlane.xlu1 %678 }
 0x2a9   :  { %v691_v47 = vsub.f32 %v654_v14, %v679_v46 }
 0x2ab   :  { %v1197_v48 = vpop.eup %1196  ;;  %v704_v49 = vmul.f32 1.442695, %v691_v47 }
 0x2ac   :  { %v722_v50 = vsel %vm661_vm1, %v1197_v48, 0.0  ;;  %v1199_v6 = vpop.eup %1198 }
 0x2ad   :  { %1200 = vpow2.f32 %v704_v49  ;;  %723 = vadd.xlane.f32.xlu0 %v722_v50  ;;  %v719_v54 = vsel %vm661_vm1, %v1199_v6, 0.0 }
 0x2b0   :  { %v682_v51 = vpop.xlane.xlu2 %681 }
 0x2b1   :  { %v692_v52 = vsub.f32 %v657_v17, %v682_v51 }
 0x2b3   :  { %v1201_v8 = vpop.eup %1200  ;;  %v706_v9 = vmul.f32 1.442695, %v692_v52 }
 0x2b4   :  { %v725_v53 = vsel %vm661_vm1, %v1201_v8, 0.0 }
 0x2b5   :  { %1202 = vpow2.f32 %v706_v9  ;;  %726 = vadd.xlane.f32.xlu1 %v725_v53  ;;  %720 = vadd.xlane.f32.xlu0 %v719_v54 }
 0x2b8   :  { %v685_v55 = vpop.xlane.xlu2 %684 }
 0x2b9   :  { %v693_v56 = vsub.f32 %v659_v20, %v685_v55 }
 0x2bb   :  { %v1203_v57 = vpop.eup %1202  ;;  %v708_v36 = vmul.f32 1.442695, %v693_v56 }
 0x2bc   :  { %v728_v37 = vsel %vm661_vm1, %v1203_v57, 0.0 }
 0x2bd   :  { %1204 = vpow2.f32 %v708_v36  ;;  %729 = vadd.xlane.f32.xlu1 %v728_v37 }
 0x2c3   :  { %v1205_v40 = vpop.eup %1204 }
 0x2c4   :  { %v731_v41 = vsel %vm661_vm1, %v1205_v40, 0.0 }
 0x2c5   :  { %732 = vadd.xlane.f32.xlu2 %v731_v41 }
 0x300   :  { %v712_v58 = vpop.xlane.xlu2 %711 }
 0x301   :  { %1206 = vrcp.f32 %v712_v58 }
 0x307   :  { %v1207_v60 = vpop.eup %1206 }
 0x308   :  { %v715_v59 = vpop.xlane.xlu2 %714  ;;  %v742_v27 = vmul.f32 %v1207_v60, %v1191_v29 }
 0x309   :  { %1208 = vrcp.f32 %v715_v59 }
 0x30a   :  { %v750_v61 = vpack.c.bf16 %v742_v27, %v742_v27 }
 0x30c   :  { %v766_v62 = vunpack.c.l.b16 %v750_v61 }
 0x30f   :  { %v1209_v63 = vpop.eup %1208 }
 0x310   :  { %v743_v3 = vmul.f32 %v1209_v63, %v1193_v32  ;;  %v718_v10 = vpop.xlane.xlu2 %717 }
 0x312   :  { %v751_v26 = vpack.c.bf16 %v743_v3, %v743_v3 }
 0x314   :  { %v767_v4 = vunpack.c.l.b16 %v751_v26 }
 0x316   :  { %v770_v5 = vpack.c.b16 %v767_v4, %v766_v62 }
 0x318   :  { %1122 = vmatmul.msk.bf16.vlgmr.msra.gmra.mxu2 %vm661_vm1, %v770_v5 }
 0x320   :  { %v724_v7 = vpop.xlane.xlu0 %723 }
 0x321   :  { %1210 = vrcp.f32 %v724_v7 }
 0x322   :  { %1212 = vrcp.f32 %v718_v10 }
 0x327   :  { %v1211_v13 = vpop.eup %1210 }
 0x328   :  { %v727_v11 = vpop.xlane.xlu1 %726  ;;  %v721_v12 = vpop.xlane.xlu0 %720  ;;  %v746_v15 = vmul.f32 %v1211_v13, %v1197_v48 }
 0x329   :  { %1214 = vrcp.f32 %v727_v11  ;;  %v1213_v14 = vpop.eup %1212 }
 0x32a   :  { %1216 = vrcp.f32 %v721_v12  ;;  %v744_v16 = vmul.f32 %v1213_v14, %v1717_v34  ;;  %v754_v19 = vpack.c.bf16 %v746_v15, %v746_v15 }
 0x32c   :  { %v752_v23 = vpack.c.bf16 %v744_v16, %v744_v16  ;;  %v813_v0 = vunpack.c.l.b16 %v754_v19 }
 0x32e   :  { %v768_v30 = vunpack.c.l.b16 %v752_v23 }
 0x32f   :  { %v1215_v17 = vpop.eup %1214 }
 0x330   :  { %v1217_v18 = vpop.eup %1216  ;;  %v747_v20 = vmul.f32 %v1215_v17, %v1201_v8  ;;  %v730_v21 = vpop.xlane.xlu1 %729 }
 0x331   :  { %v745_v22 = vmul.f32 %v1217_v18, %v1199_v6  ;;  %1218 = vrcp.f32 %v730_v21 }
 0x332   :  { %v755_v24 = vpack.c.bf16 %v747_v20, %v747_v20 }
 0x333   :  { %v753_v28 = vpack.c.bf16 %v745_v22, %v745_v22 }
 0x334   :  { %v814_v29 = vunpack.c.l.b16 %v755_v24 }
 0x335   :  { %v769_v1 = vunpack.c.l.b16 %v753_v28 }
 0x336   :  { %v817_v2 = vpack.c.b16 %v814_v29, %v813_v0 }
 0x337   :  { %v771_v31 = vpack.c.b16 %v769_v1, %v768_v30  ;;  %v1219_v33 = vpop.eup %1218 }
 0x338   :  { %v733_v32 = vpop.xlane.xlu2 %732  ;;  %1124 = vmatmul.msk.bf16.vlgmr.msra.gmra.mxu3 %vm661_vm1, %v817_v2  ;;  %v748_v25 = vmul.f32 %v1219_v33, %v1203_v57 }
 0x339   :  { %1220 = vrcp.f32 %v733_v32  ;;  %1123 = vmatmul.msk.bf16.gmra.mxu2 %vm661_vm1, %v771_v31 }
 0x33a   :  { %v756_v38 = vpack.c.bf16 %v748_v25, %v748_v25 }
 0x33c   :  { %v815_v42 = vunpack.c.l.b16 %v756_v38 }
 0x33f   :  { %v1221_v34 = vpop.eup %1220 }
 0x340   :  { %v749_v35 = vmul.f32 %v1221_v34, %v1205_v40 }
 0x342   :  { %v757_v39 = vpack.c.bf16 %v749_v35, %v749_v35 }
 0x344   :  { %v816_v43 = vunpack.c.l.b16 %v757_v39 }
 0x346   :  { %v818_v44 = vpack.c.b16 %v816_v43, %v815_v42 }
 0x348   :  { %1125 = vmatmul.msk.bf16.gmra.mxu3 %vm661_vm1, %v818_v44 }
 0x39b   :  { %v795_v45 = vpop.f32.mrf.mxu2 }
 0x39c   :  { %852 = vst.msk [vmem:[#allocation2] sm:$0xff] %vm584_vm0, %v795_v45 }
 0x3a3   :  { %v797_v46 = vpop.f32.mrf.mxu2 }
 0x3a4   :  { %853 = vst.msk [vmem:[#allocation2 + $0x8] sm:$0xff] %vm584_vm0, %v797_v46 }
 0x3bb   :  { %v842_v47 = vpop.f32.mrf.mxu3 }
 0x3bc   :  { %v800_v48 = vpop.f32.mrf.mxu2  ;;  %856 = vst.msk [vmem:[#allocation2 + $0x20] sm:$0xff] %vm584_vm0, %v842_v47 }
 0x3bd   :  { %854 = vst.msk [vmem:[#allocation2 + $0x10] sm:$0xff] %vm584_vm0, %v800_v48 }
 0x3c3   :  { %v844_v49 = vpop.f32.mrf.mxu3 }
 0x3c4   :  { %v802_v50 = vpop.f32.mrf.mxu2  ;;  %857 = vst.msk [vmem:[#allocation2 + $0x28] sm:$0xff] %vm584_vm0, %v844_v49 }
 0x3c5   :  { %855 = vst.msk [vmem:[#allocation2 + $0x18] sm:$0xff] %vm584_vm0, %v802_v50 }
 0x3cb   :  { %v847_v51 = vpop.f32.mrf.mxu3 }
 0x3cc   :  { %858 = vst.msk [vmem:[#allocation2 + $0x30] sm:$0xff] %vm584_vm0, %v847_v51 }
 0x3d3   :  { %v849_v6 = vpop.f32.mrf.mxu3 }
 0x3d4   :  { %859 = vst.msk [vmem:[#allocation2 + $0x38] sm:$0xff] %vm584_vm0, %v849_v6 }
 0x3d5   :  { %872 = dma.vmem_to_hbm [thread:$0]  %s865_s16, 1024, %s867_s19, [#allocation3], %s1250_s20, %s1250_s20, %s1251_s21  }
 0x3d6   :  { %1246 = dma.done.wait [#allocation3], 1024  }
 0x3d7   :  { %1247 = vsyncadd [#allocation3], 4294966272 }
 0x3d8   :  { %877 = vsyncpa [#allocation3], 1 }

</bundles_post_ra>
